<compile_context>
chip_gen: v5e
topology: v5e:2x2
jax: 0.10.0
libtpu: 0.0.40
codegen_flags: <defaults>
</compile_context>

<pallas_src>
import functools

import jax
import jax.numpy as jnp
from jax.experimental import pallas as pl
from jax.experimental.pallas import tpu as pltpu


_MAX_FOLDS = 512  # cap on tile_hw // 128 so the in-kernel lane fold stays a small unroll


def _cdiv(a: int, b: int) -> int:
    return (a + b - 1) // b


def _round_up(x: int, m: int) -> int:
    return _cdiv(x, m) * m


def _vmem_capacity_bytes() -> int:
    """Best-effort per-core VMEM capacity; conservative fallback (v7x per-TC)."""
    try:
        cap = int(pltpu.get_tpu_info().vmem_capacity_bytes)
        if cap > 0:
            return cap
    except Exception:
        pass
    return 64 << 20


def _choose_tiles(rows: int, hw: int, pair_bytes: int, tile_bytes: int):
    """Pick (tile_rows, tile_hw, nr, nh) for a cdiv grid.

    tile_bytes ~= combined pred+target bytes per grid step.  Tiles are
    balanced so the last tile is never mostly empty, tile_hw is always a
    multiple of 128 (bounded by _MAX_FOLDS*128 for the in-kernel fold) and
    tile_rows a multiple of 8.
    """
    max_elems = max(tile_bytes // pair_bytes, 8 * 128)
    hw128 = _round_up(hw, 128)
    rows8 = _round_up(rows, 8)

    # hw tiling (lane axis): balanced, multiple of 128.
    max_tile_hw = min(hw128, _MAX_FOLDS * 128,
                      max(((max_elems // 8) // 128) * 128, 128))
    max_tile_hw = max(max_tile_hw, 128)
    nh = _cdiv(hw, max_tile_hw)
    tile_hw = _round_up(_cdiv(hw, nh), 128)
    nh = _cdiv(hw, tile_hw)

    # row tiling (sublane axis): balanced, multiple of 8, fills the budget.
    max_tile_rows = min(rows8, max(((max_elems // tile_hw) // 8) * 8, 8))
    nr = _cdiv(rows, max_tile_rows)
    tile_rows = _round_up(_cdiv(rows, nr), 8)
    nr = _cdiv(rows, tile_rows)

    # v7x megacore: guarantee >= 2 (parallel) grid steps when there is enough work.
    if nr * nh == 1 and rows > 8:
        tile_rows = _round_up(_cdiv(rows, 2), 8)
        nr = _cdiv(rows, tile_rows)

    return tile_rows, tile_hw, nr, nh


def _bce_lane_sum_kernel(pred_ref, tgt_ref, out_ref, *, hw, tile_hw, mask_cols):
    """One (tile_rows, tile_hw) tile -> (tile_rows, 128) lane-partial loss sums."""
    x = pred_ref[...].astype(jnp.float32)
    y = tgt_ref[...].astype(jnp.float32)
    # Numerically stable BCE with logits: max(x,0) - x*y + log1p(exp(-|x|))
    loss = jnp.maximum(x, 0.0) - x * y + jnp.log1p(jnp.exp(-jnp.abs(x)))

    if mask_cols:
        # Ragged tail along hw: zero out columns past the true extent.  Rows
        # past the true row count land in out-of-bounds output rows and are
        # dropped by the partial write-back, so no row mask is needed.
        col = (pl.program_id(1) * tile_hw
               + jax.lax.broadcasted_iota(jnp.int32, loss.shape, 1))
        loss = jnp.where(col < hw, loss, 0.0)

    # Fold 128-lane column groups with VPU adds (no XLU, no relayout).
    nf = tile_hw // 128
    part = loss[:, 0:128]
    for c in range(1, nf):
        part = part + loss[:, c * 128:(c + 1) * 128]
    out_ref[...] = part


@functools.partial(jax.jit, static_argnames=("tile_bytes", "vmem_cap"))
def _bce_impl(pred, target, weight, *, tile_bytes, vmem_cap):
    N, C, H, W = pred.shape
    rows, hw = N * C, H * W

    pair_bytes = pred.dtype.itemsize + target.dtype.itemsize
    tile_rows, tile_hw, nr, nh = _choose_tiles(rows, hw, pair_bytes, tile_bytes)
    mask_cols = (hw % tile_hw) != 0

    pred2d = pred.reshape(rows, hw)
    tgt2d = target.reshape(rows, hw)

    kernel = functools.partial(_bce_lane_sum_kernel,
                               hw=hw, tile_hw=tile_hw, mask_cols=mask_cols)

    # VMEM budget: double-buffered inputs + outputs, plus headroom for the
    # compiler's f32 elementwise intermediates; capped well inside physical VMEM.
    tile_in_bytes = tile_rows * tile_hw * pair_bytes
    out_tile_bytes = tile_rows * 128 * 4
    needed = 4 * tile_in_bytes + 2 * out_tile_bytes + (2 << 20)
    vmem_limit = int(min(max(needed, 16 << 20), max(vmem_cap * 5 // 8, 16 << 20)))

    lane_sums = pl.pallas_call(
        kernel,
        out_shape=jax.ShapeDtypeStruct((rows, nh * 128), jnp.float32),
        grid_spec=pltpu.PrefetchScalarGridSpec(
            num_scalar_prefetch=0,
            grid=(nr, nh),
            in_specs=[
                pl.BlockSpec((tile_rows, tile_hw), lambda i, j: (i, j)),
                pl.BlockSpec((tile_rows, tile_hw), lambda i, j: (i, j)),
            ],
            out_specs=pl.BlockSpec((tile_rows, 128), lambda i, j: (i, j)),
        ),
        compiler_params=pltpu.CompilerParams(
            dimension_semantics=("parallel", "parallel"),
            vmem_limit_bytes=vmem_limit,
        ),
    )(pred2d, tgt2d)

    # Finish the reduction in the wrapper (tiny (rows, nh*128) array).
    row_sums = jnp.sum(lane_sums, axis=1)  # (rows,)

    if weight is not None:
        # torch: weight.reshape(-1,1,1) -> per-channel scale broadcast over N,H,W.
        # Applying it to per-row sums is mathematically identical.
        w = jnp.asarray(weight, jnp.float32).reshape(-1)
        w_rows = jnp.broadcast_to(w[None, :], (N, C)).reshape(rows)
        total = jnp.sum(row_sums * w_rows)
    else:
        total = jnp.sum(row_sums)

    # PyTorch default reduction='mean' over ALL elements.
    return total / jnp.float32(rows * hw)


def binary_cross_entropy(pred, target, mask=None, weight=None, *, tile_bytes=None):
    """Pallas TPU BinaryCrossEntropy.forward.

    pred, target: (N, C, H, W) logits / targets.  mask is accepted but unused
    (the reference forward ignores it).  weight: optional per-channel (C,)
    weight.  Returns a scalar f32 loss = mean over all elements of the
    weighted, numerically-stable BCE-with-logits.
    """
    del mask  # reference module ignores it
    vmem_cap = _vmem_capacity_bytes()
    if tile_bytes is None:
        # ~8 MiB combined pred+target per grid step: inside the 8-16 MiB sweet
        # spot on v5e/v6e (128 MiB VMEM) and the 4-8 MiB target on v7x (64 MiB).
        tile_bytes = 8 << 20
    return _bce_impl(pred, target, weight,
                     tile_bytes=int(tile_bytes), vmem_cap=int(vmem_cap))


if __name__ == "__main__":
    key = jax.random.PRNGKey(0)
    k1, k2, k3 = jax.random.split(key, 3)

    N, C, H, W = 2, 4, 16, 16
    pred = jax.random.normal(k1, (N, C, H, W), dtype=jnp.float32)
    target = (jax.random.uniform(k2, (N, C, H, W)) > 0.5).astype(jnp.float32)
    mask = (jax.random.uniform(k3, (N, C, H, W)) > 0.5).astype(jnp.float32)  # unused
    weight = jnp.array([0.5, 1.0, 1.5, 2.0], dtype=jnp.float32)

    def ref_loss(x, y, w):
        x = x.astype(jnp.float32)
        y = y.astype(jnp.float32)
        l = jnp.maximum(x, 0.0) - x * y + jnp.log1p(jnp.exp(-jnp.abs(x)))
        if w is not None:
            l = l * jnp.asarray(w, jnp.float32).reshape(1, -1, 1, 1)
        return jnp.mean(l)

    # weighted and unweighted variants (single tile, both grid axes size 1)
    loss_w = binary_cross_entropy(pred, target, mask, weight=weight)
    loss_u = binary_cross_entropy(pred, target, mask, weight=None)
    jax.block_until_ready((loss_w, loss_u))
    assert jnp.allclose(loss_w, ref_loss(pred, target, weight), atol=1e-5)
    assert jnp.allclose(loss_u, ref_loss(pred, target, None), atol=1e-5)

    # bf16 inputs: kernel upcasts in-register, HBM traffic halves
    pred_bf, tgt_bf = pred.astype(jnp.bfloat16), target.astype(jnp.bfloat16)
    loss_bf = binary_cross_entropy(pred_bf, tgt_bf, mask, weight=weight)
    assert jnp.allclose(loss_bf, ref_loss(pred_bf, tgt_bf, weight), atol=1e-4)

    # ragged shape: rows=6 (not a multiple of 8), hw=400 (not a multiple of 128)
    # -> in-kernel column masking + partial boundary blocks, no jnp.pad copies.
    N2, C2, H2, W2 = 2, 3, 20, 20
    p2 = jax.random.normal(k1, (N2, C2, H2, W2), dtype=jnp.float32)
    t2 = (jax.random.uniform(k2, (N2, C2, H2, W2)) > 0.5).astype(jnp.float32)
    w2 = jnp.array([0.5, 1.0, 2.0], dtype=jnp.float32)
    loss2 = binary_cross_entropy(p2, t2, None, weight=w2)
    assert jnp.allclose(loss2, ref_loss(p2, t2, w2), atol=1e-5)

    # tiny tile budget -> exercises hw tiling (nh > 1), per-block lane-partials
    loss3 = binary_cross_entropy(p2, t2, None, weight=w2, tile_bytes=8 * 1024)
    assert jnp.allclose(loss3, ref_loss(p2, t2, w2), atol=1e-5)

    # rows > 8 fitting one natural tile -> exercises the >=2 parallel-step split
    N3, C3 = 2, 8
    p3 = jax.random.normal(k3, (N3, C3, H, W), dtype=jnp.float32)
    t3 = (jax.random.uniform(k1, (N3, C3, H, W)) > 0.5).astype(jnp.float32)
    loss4 = binary_cross_entropy(p3, t3, None, weight=None)
    assert jnp.allclose(loss4, ref_loss(p3, t3, None), atol=1e-5)

    jax.block_until_ready((loss_bf, loss2, loss3, loss4))
    print("KERNEL_OK")
</pallas_src>

<mosaic_0001>
module attributes {stable_mosaic.version = 11 : i64} {
  func.func @_bce_lane_sum_kernel(%arg0: i32, %arg1: i32, %arg2: memref<8x256xf32, #tpu.memory_space<vmem>>, %arg3: memref<8x256xf32, #tpu.memory_space<vmem>>, %arg4: memref<8x128xf32, #tpu.memory_space<vmem>>) attributes {dimension_semantics = [#tpu.dimension_semantics<parallel>, #tpu.dimension_semantics<parallel>], iteration_bounds = array<i64: 1, 1>, scalar_prefetch = 0 : i64, scratch_operands = 0 : i64, tpu.core_type = #tpu.core_type<tc>, window_params = [{transform_indices = @transform_0, window_bounds = array<i64: 8, 256>}, {transform_indices = @transform_1, window_bounds = array<i64: 8, 256>}, {transform_indices = @transform_2, window_bounds = array<i64: 8, 128>}]} {
    %c0 = arith.constant 0 : index
    %c0_0 = arith.constant 0 : index
    %0 = vector.load %arg2[%c0, %c0_0] : memref<8x256xf32, #tpu.memory_space<vmem>>, vector<8x256xf32>
    %c0_1 = arith.constant 0 : index
    %c0_2 = arith.constant 0 : index
    %1 = vector.load %arg3[%c0_1, %c0_2] : memref<8x256xf32, #tpu.memory_space<vmem>>, vector<8x256xf32>
    %cst = arith.constant 0.000000e+00 : f32
    %2 = vector.broadcast %cst : f32 to vector<8x256xf32>
    %3 = arith.maximumf %0, %2 : vector<8x256xf32>
    %4 = arith.mulf %0, %1 : vector<8x256xf32>
    %5 = arith.subf %3, %4 : vector<8x256xf32>
    %6 = math.absf %0 : vector<8x256xf32>
    %cst_3 = arith.constant 0.000000e+00 : f32
    %7 = vector.broadcast %cst_3 : f32 to vector<8x256xf32>
    %8 = arith.subf %7, %6 : vector<8x256xf32>
    %9 = math.exp %8 : vector<8x256xf32>
    %10 = math.log1p %9 : vector<8x256xf32>
    %11 = arith.addf %5, %10 : vector<8x256xf32>
    %12 = vector.extract_strided_slice %11 {offsets = [0, 0], sizes = [8, 128], strides = [1, 1]} : vector<8x256xf32> to vector<8x128xf32>
    %13 = vector.extract_strided_slice %11 {offsets = [0, 128], sizes = [8, 128], strides = [1, 1]} : vector<8x256xf32> to vector<8x128xf32>
    %14 = arith.addf %12, %13 : vector<8x128xf32>
    %c0_4 = arith.constant 0 : index
    %c0_5 = arith.constant 0 : index
    %15 = vector.load %arg4[%c0_4, %c0_5] : memref<8x128xf32, #tpu.memory_space<vmem>>, vector<8x128xf32>
    tpu.vector_store %arg4[%c0_4, %c0_5], %14 {strides = array<i32>} : memref<8x128xf32, #tpu.memory_space<vmem>>, vector<8x128xf32>,
    return
  }
  func.func @transform_0(%arg0: i32, %arg1: i32) -> (i32, i32) {
    %c0_i32 = arith.constant 0 : i32
    return %arg0, %arg1 : i32, i32
  }
  func.func @transform_1(%arg0: i32, %arg1: i32) -> (i32, i32) {
    %c0_i32 = arith.constant 0 : i32
    return %arg0, %arg1 : i32, i32
  }
  func.func @transform_2(%arg0: i32, %arg1: i32) -> (i32, i32) {
    %c0_i32 = arith.constant 0 : i32
    return %arg0, %arg1 : i32, i32
  }
}

</mosaic_0001>

<bundles_post_ra>
// kernel: _bce_impl.1
= control target key start
LH: loop header
LB: loop body
LE: loop exit
PB: predicated region body
PF: predicated region fallthrough
CT: control target
= control target key end

     0   :  { %s93_s0 = inlined_call_operand.vmem [shape: f32[8,256], index: 0, kind: input, shape index: {}]   ;;  %s94_s1 = inlined_call_operand.vmem [shape: f32[8,256], index: 1, kind: input, shape index: {}]   ;;  %s95_s2 = inlined_call_operand.vmem [shape: f32[8,128], index: 2, kind: output, shape index: {}]  }
   0x1   :  { %v11_v0 = vld [vmem:[%s93_s0] sm:$0xff]  ;;  %v12_v1 = vld [vmem:[%s93_s0 + $0x8] sm:$0xff] }
   0x2   :  { %v21_v2 = vand.u32 2147483647, %v11_v0  ;;  %v22_v3 = vand.u32 2147483647, %v12_v1  ;;  %v13_v12 = vld [vmem:[%s94_s1] sm:$0xff]  ;;  %v14_v15 = vld [vmem:[%s94_s1 + $0x8] sm:$0xff] }
   0x3   :  { %v15_v17 = vmax.f32 %v11_v0, 0.0  ;;  %v17_v18 = vmul.f32 %v13_v12, %v11_v0  ;;  %v16_v21 = vmax.f32 %v12_v1, 0.0  ;;  %v18_v22 = vmul.f32 %v14_v15, %v12_v1 }
   0x4   :  { %v23_v4 = vsub.f32 0.0, %v21_v2  ;;  %v24_v5 = vsub.f32 0.0, %v22_v3 }
   0x5   :  { %v19_v26 = vsub.f32 %v15_v17, %v17_v18  ;;  %v20_v29 = vsub.f32 %v16_v21, %v18_v22 }
   0x6   :  { %v25_v6 = vmul.f32 1.442695, %v23_v4  ;;  %v27_v7 = vmul.f32 1.442695, %v24_v5 }
   0x8   :  { %55 = vpow2.f32 %v25_v6 }
   0x9   :  { %57 = vpow2.f32 %v27_v7 }
   0xe   :  { %v56_v8 = vpop.eup %55 }
   0xf   :  { %v58_v9 = vpop.eup %57  ;;  %v29_v10 = vadd.f32 1.0, %v56_v8  ;;  %v32_v11 = vmul.f32 -0.5, %v56_v8  ;;  %v35_v19 = vand.u32 2147483647, %v56_v8 }
  0x10   :  { %v38_v13 = vadd.f32 1.0, %v58_v9  ;;  %v41_v14 = vmul.f32 -0.5, %v58_v9  ;;  %v44_v23 = vand.u32 2147483647, %v58_v9 }
  0x11   :  { %59 = vlog2.f32 %v29_v10  ;;  %v33_v16 = vadd.f32 1.0, %v32_v11  ;;  %vm36_vm0 = vcmp.lt.f32.partialorder %v35_v19, 0.0004427343 }
  0x12   :  { %61 = vlog2.f32 %v38_v13  ;;  %v42_v20 = vadd.f32 1.0, %v41_v14  ;;  %vm45_vm1 = vcmp.lt.f32.partialorder %v44_v23, 0.0004427343 }
  0x13   :  { %v34_v24 = vmul.f32 %v56_v8, %v33_v16 }
  0x14   :  { %v43_v27 = vmul.f32 %v58_v9, %v42_v20 }
  0x17   :  { %v60_v25 = vpop.eup %59 }
  0x18   :  { %v62_v28 = vpop.eup %61  ;;  %v31_v30 = vmul.f32 0.6931472, %v60_v25 }
  0x19   :  { %v40_v31 = vmul.f32 0.6931472, %v62_v28 }
  0x1a   :  { %v37_v32 = vsel %vm36_vm0, %v34_v24, %v31_v30 }
  0x1b   :  { %v46_v33 = vsel %vm45_vm1, %v43_v27, %v40_v31  ;;  %v47_v34 = vadd.f32 %v37_v32, %v19_v26 }
  0x1c   :  { %v48_v35 = vadd.f32 %v46_v33, %v20_v29 }
  0x1e   :  { %v49_v36 = vadd.f32 %v48_v35, %v47_v34 }
  0x20   :  { %50 = vst [vmem:[%s95_s2] sm:$0xff] %v49_v36 }

</bundles_post_ra>
